<compile_context>
chip_gen: v6e
topology: v6e:2x2x1
jax: 0.10.0
libtpu: 0.0.40
codegen_flags: <defaults>
</compile_context>

<pallas_src>
import numpy as np
import jax
import jax.numpy as jnp
from jax.experimental import pallas as pl
from jax.experimental.pallas import tpu as pltpu


# ----------------------------- config (small-shape ModelArgs analogue) -----------------------
DIM = 64
MULTIPLE_OF = 32          # scaled-down analogue of ModelArgs.multiple_of
LANE = 128
SUBLANE = 8


def find_multiple(n, k):
    return n if n % k == 0 else n + k - n % k


HIDDEN = find_multiple(int(2 * (4 * DIM) / 3), MULTIPLE_OF)   # 192  (FeedForward hidden dim)
HIDDEN_PAD = find_multiple(HIDDEN, LANE)                      # 256  (lane-aligned halves)


# ----------------------------- Pallas kernel -----------------------------
def ffn_kernel(x_ref, w13_ref, w2_ref, out_ref):
    # x_ref:   (TM, DIM)              float32 token tile
    # w13_ref: (DIM, 2*HIDDEN_PAD)    bfloat16  [w1^T | w3^T], hidden zero-padded
    # w2_ref:  (HIDDEN_PAD, DIM)      bfloat16  w2^T, hidden zero-padded rows
    # out_ref: (TM, DIM)              float32
    x = x_ref[...].astype(jnp.bfloat16)
    h = jnp.dot(x, w13_ref[...], preferred_element_type=jnp.float32)      # (TM, 2*HP), f32 acc
    a = h[:, :HIDDEN_PAD]                                                 # w1(x)  (gate)
    b = h[:, HIDDEN_PAD:]                                                 # w3(x)  (up)
    f = (a * jax.nn.sigmoid(a)) * b                                       # SwiGLU (f32, VPU/EUP)
    out_ref[...] = jnp.dot(f.astype(jnp.bfloat16), w2_ref[...],
                           preferred_element_type=jnp.float32).astype(out_ref.dtype)


# ----------------------------- one-time weight preprocessing (hoisted out of forward) --------
def prepare_ffn_params(w1, w2, w3):
    """w1, w3: (HIDDEN, DIM); w2: (DIM, HIDDEN) in PyTorch nn.Linear layout (y = x @ W.T).
    Returns lane-aligned, pre-transposed, pre-fused bf16 weights for the kernel."""
    pad_h = HIDDEN_PAD - HIDDEN
    w1_t = jnp.pad(w1.T, ((0, 0), (0, pad_h)))                            # (D, HP)
    w3_t = jnp.pad(w3.T, ((0, 0), (0, pad_h)))                            # (D, HP)
    w13_t = jnp.concatenate([w1_t, w3_t], axis=1).astype(jnp.bfloat16)    # (D, 2*HP)
    w2_t = jnp.pad(w2.T, ((0, pad_h), (0, 0))).astype(jnp.bfloat16)       # (HP, D)
    return w13_t, w2_t


# ----------------------------- pallas_call wrapper -----------------------------
@jax.jit
def feed_forward(x, w13_t, w2_t):
    # TODO(synk): ffn_dropout is identity in eval mode; training-mode dropout not implemented.
    orig_shape = x.shape
    d = orig_shape[-1]
    xf = x.reshape(-1, d).astype(jnp.float32)           # fold batch+seq into one token axis
    n = xf.shape[0]
    tm = 256 if n >= 256 else find_multiple(n, SUBLANE)
    n_pad = find_multiple(n, tm)
    if n_pad != n:
        xf = jnp.pad(xf, ((0, n_pad - n), (0, 0)))

    out = pl.pallas_call(
        ffn_kernel,
        out_shape=jax.ShapeDtypeStruct((n_pad, d), jnp.float32),
        grid=(n_pad // tm,),
        in_specs=[
            pl.BlockSpec((tm, d), lambda i: (i, 0)),                  # x token tile
            pl.BlockSpec((d, 2 * HIDDEN_PAD), lambda i: (0, 0)),      # fused [w1|w3]^T (bf16)
            pl.BlockSpec((HIDDEN_PAD, d), lambda i: (0, 0)),          # w2^T (bf16)
        ],
        out_specs=pl.BlockSpec((tm, d), lambda i: (i, 0)),
        compiler_params=pltpu.CompilerParams(dimension_semantics=("parallel",)),
    )(xf, w13_t, w2_t)

    return out[:n].reshape(orig_shape)


# ----------------------------- references -----------------------------
def reference_f32(x, w1, w2, w3):
    """Exact f32 mirror of the PyTorch module (eval mode)."""
    a = x @ w1.T
    b = x @ w3.T
    return (jax.nn.silu(a) * b) @ w2.T


def reference_matched(x, w13_t, w2_t):
    """Same math as the kernel (bf16 operands, f32 accumulation) for a tight comparison."""
    xf = x.reshape(-1, x.shape[-1]).astype(jnp.bfloat16)
    h = jnp.dot(xf, w13_t, preferred_element_type=jnp.float32)
    a, b = h[:, :HIDDEN_PAD], h[:, HIDDEN_PAD:]
    f = (a * jax.nn.sigmoid(a)) * b
    out = jnp.dot(f.astype(jnp.bfloat16), w2_t, preferred_element_type=jnp.float32)
    return out.reshape(x.shape)


# ----------------------------- main -----------------------------
if __name__ == "__main__":
    key = jax.random.PRNGKey(0)
    k_x, k1, k2, k3 = jax.random.split(key, 4)

    B, T = 2, 8
    std = 0.02                                            # ModelArgs.initializer_range
    x = jax.random.normal(k_x, (B, T, DIM), jnp.float32)
    w1 = jax.random.normal(k1, (HIDDEN, DIM), jnp.float32) * std
    w2 = jax.random.normal(k2, (DIM, HIDDEN), jnp.float32) * std
    w3 = jax.random.normal(k3, (HIDDEN, DIM), jnp.float32) * std

    # one-time preprocessing (hoisted out of the forward pass)
    w13_t, w2_t = prepare_ffn_params(w1, w2, w3)

    y = feed_forward(x, w13_t, w2_t)
    y = jax.block_until_ready(y)
    assert y.shape == (B, T, DIM), y.shape
    assert y.dtype == jnp.float32

    # tight check against a precision-matched reference
    ref_m = reference_matched(x, w13_t, w2_t)
    np.testing.assert_allclose(np.asarray(y), np.asarray(ref_m), rtol=1e-3, atol=1e-5)

    # loose check against the pure-f32 PyTorch-equivalent reference (bf16 operand rounding)
    ref_f = reference_f32(x, w1, w2, w3)
    np.testing.assert_allclose(np.asarray(y), np.asarray(ref_f), rtol=5e-2, atol=1e-3)

    print("KERNEL_OK")
</pallas_src>

<mosaic_0001>
module attributes {stable_mosaic.version = 11 : i64} {
  func.func @ffn_kernel(%arg0: i32, %arg1: memref<16x64xf32, #tpu.memory_space<vmem>>, %arg2: memref<64x512xbf16, #tpu.memory_space<vmem>>, %arg3: memref<256x64xbf16, #tpu.memory_space<vmem>>, %arg4: memref<16x64xf32, #tpu.memory_space<vmem>>) attributes {dimension_semantics = [#tpu.dimension_semantics<parallel>], iteration_bounds = array<i64: 1>, scalar_prefetch = 0 : i64, scratch_operands = 0 : i64, tpu.core_type = #tpu.core_type<tc>, window_params = [{transform_indices = @transform_0, window_bounds = array<i64: 16, 64>}, {pipeline_mode = #tpu.pipeline_mode<synchronous>, transform_indices = @transform_1, window_bounds = array<i64: 64, 512>}, {pipeline_mode = #tpu.pipeline_mode<synchronous>, transform_indices = @transform_2, window_bounds = array<i64: 256, 64>}, {transform_indices = @transform_3, window_bounds = array<i64: 16, 64>}]} {
    %c0 = arith.constant 0 : index
    %c0_0 = arith.constant 0 : index
    %0 = vector.load %arg1[%c0, %c0_0] : memref<16x64xf32, #tpu.memory_space<vmem>>, vector<16x64xf32>
    %1 = arith.truncf %0 : vector<16x64xf32> to vector<16x64xbf16>
    %c0_1 = arith.constant 0 : index
    %c0_2 = arith.constant 0 : index
    %2 = vector.load %arg2[%c0_1, %c0_2] : memref<64x512xbf16, #tpu.memory_space<vmem>>, vector<64x512xbf16>
    %cst = arith.constant dense<0.000000e+00> : vector<16x512xf32>
    %3 = tpu.matmul %1, %2, %cst {dimension_numbers = #tpu.dot_dimension_numbers<[1], [0], [0], [1], [0, 0, 1, 1], [], []>} : vector<16x64xbf16>, vector<64x512xbf16>, vector<16x512xf32> -> vector<16x512xf32>
    %4 = vector.extract_strided_slice %3 {offsets = [0, 0], sizes = [16, 256], strides = [1, 1]} : vector<16x512xf32> to vector<16x256xf32>
    %5 = vector.extract_strided_slice %3 {offsets = [0, 256], sizes = [16, 256], strides = [1, 1]} : vector<16x512xf32> to vector<16x256xf32>
    %6 = arith.negf %4 : vector<16x256xf32>
    %7 = math.exp %6 : vector<16x256xf32>
    %cst_3 = arith.constant 1.000000e+00 : f32
    %8 = vector.broadcast %cst_3 : f32 to vector<16x256xf32>
    %9 = arith.addf %8, %7 : vector<16x256xf32>
    %10 = arith.divf %8, %9 : vector<16x256xf32>
    %11 = arith.mulf %4, %10 : vector<16x256xf32>
    %12 = arith.mulf %11, %5 : vector<16x256xf32>
    %13 = arith.truncf %12 : vector<16x256xf32> to vector<16x256xbf16>
    %c0_4 = arith.constant 0 : index
    %c0_5 = arith.constant 0 : index
    %14 = vector.load %arg3[%c0_4, %c0_5] : memref<256x64xbf16, #tpu.memory_space<vmem>>, vector<256x64xbf16>
    %cst_6 = arith.constant dense<0.000000e+00> : vector<16x64xf32>
    %15 = tpu.matmul %13, %14, %cst_6 {dimension_numbers = #tpu.dot_dimension_numbers<[1], [0], [0], [1], [0, 0, 1, 1], [], []>} : vector<16x256xbf16>, vector<256x64xbf16>, vector<16x64xf32> -> vector<16x64xf32>
    %c0_7 = arith.constant 0 : index
    %c0_8 = arith.constant 0 : index
    %16 = vector.load %arg4[%c0_7, %c0_8] : memref<16x64xf32, #tpu.memory_space<vmem>>, vector<16x64xf32>
    tpu.vector_store %arg4[%c0_7, %c0_8], %15 {strides = array<i32>} : memref<16x64xf32, #tpu.memory_space<vmem>>, vector<16x64xf32>,
    return
  }
  func.func @transform_0(%arg0: i32) -> (i32, i32) {
    %c0_i32 = arith.constant 0 : i32
    %c0_i32_0 = arith.constant 0 : i32
    return %arg0, %c0_i32 : i32, i32
  }
  func.func @transform_1(%arg0: i32) -> (i32, i32) {
    %c0_i32 = arith.constant 0 : i32
    %c0_i32_0 = arith.constant 0 : i32
    %c0_i32_1 = arith.constant 0 : i32
    return %c0_i32, %c0_i32_0 : i32, i32
  }
  func.func @transform_2(%arg0: i32) -> (i32, i32) {
    %c0_i32 = arith.constant 0 : i32
    %c0_i32_0 = arith.constant 0 : i32
    %c0_i32_1 = arith.constant 0 : i32
    return %c0_i32, %c0_i32_0 : i32, i32
  }
  func.func @transform_3(%arg0: i32) -> (i32, i32) {
    %c0_i32 = arith.constant 0 : i32
    %c0_i32_0 = arith.constant 0 : i32
    return %arg0, %c0_i32 : i32, i32
  }
}

</mosaic_0001>

<bundles_post_ra>
// kernel: feed_forward.1
= control target key start
LH: loop header
LB: loop body
LE: loop exit
PB: predicated region body
PF: predicated region fallthrough
CT: control target
= control target key end

     0   :  { %v568_v2 = vmov 0   ;;  %vm115_vm0 = vcmask 523264   ;;  %s701_s0 = inlined_call_operand.vmem [shape: f32[16,64], index: 0, kind: input, shape index: {}]   ;;  %s702_s1 = inlined_call_operand.vmem [shape: bf16[64,512], index: 1, kind: input, shape index: {}]   ;;  %s703_s2 = inlined_call_operand.vmem [shape: bf16[256,64], index: 2, kind: input, shape index: {}]   ;;  %s704_s3 = inlined_call_operand.hbm [shape: f32[16,64], index: 3, kind: output, shape index: {}]  }
   0x1   :  { %v490_v0 = vld [vmem:[%s702_s1 + $0x64] ss:$16 sps:$4 sm:$0xff]   ;;  %v492_v1 = vld [vmem:[%s702_s1 + $0x60] ss:$16 sps:$4 sm:$0xff]   ;;  %151 = vmatprep.mubr.bf16.mxu1 %v568_v2  ;;  %v17_v10 = vld [vmem:[%s701_s0 + $0x8] sm:$0xff] }
   0x2   :  { %127 = vmatprep.subr.bf16.mxu1 %v490_v0  ;;  %v493_v3 = vld [vmem:[%s702_s1 + $0x44] ss:$16 sps:$4 sm:$0xff]   ;;  %v495_v4 = vld [vmem:[%s702_s1 + $0x40] ss:$16 sps:$4 sm:$0xff]   ;;  %v504_v11 = vld [vmem:[%s702_s1 + $0x6c] ss:$16 sps:$4 sm:$0xff]  }
   0x3   :  { %128 = vmatpush1.bf16.msra.mxu1 %v492_v1  ;;  %v496_v5 = vld [vmem:[%s702_s1 + $0x24] ss:$16 sps:$4 sm:$0xff]   ;;  %v498_v6 = vld [vmem:[%s702_s1 + $0x20] ss:$16 sps:$4 sm:$0xff]   ;;  %v502_v12 = vld [vmem:[%s702_s1 + $0x68] ss:$16 sps:$4 sm:$0xff]  }
   0x4   :  { %129 = vmatprep.subr.bf16.mxu1 %v493_v3  ;;  %v499_v7 = vld [vmem:[%s702_s1 + $0x4] ss:$16 sps:$4 sm:$0xff]   ;;  %v501_v8 = vld [vmem:[%s702_s1] ss:$16 sps:$4 sm:$0xff]   ;;  %v507_v14 = vld [vmem:[%s702_s1 + $0x4c] ss:$16 sps:$4 sm:$0xff]  }
   0x5   :  { %v16_v9 = vld [vmem:[%s701_s0] sm:$0xff]  ;;  %v505_v15 = vld [vmem:[%s702_s1 + $0x48] ss:$16 sps:$4 sm:$0xff]   ;;  %v510_v16 = vld [vmem:[%s702_s1 + $0x2c] ss:$16 sps:$4 sm:$0xff]  }
   0x6   :  { %v18_v13 = vpack.c.bf16 %v17_v10, %v16_v9 }
   0x7   :  { %130 = vmatpush1.bf16.msra.mxu1 %v495_v4 }
   0x8   :  { %131 = vmatprep.subr.bf16.mxu1 %v496_v5 }
   0xb   :  { %132 = vmatpush1.bf16.msra.mxu1 %v498_v6 }
   0xc   :  { %133 = vmatprep.subr.bf16.mxu1 %v499_v7 }
   0xf   :  { %134 = vmatpush1.bf16.msra.mxu1 %v501_v8 }
  0x10   :  { %170 = vmatprep.subr.bf16.mxu1 %v504_v11 }
  0x12   :  { %442 = vmatmul.mubr.msk.bf16.vlgmr.msra.gmra.mxu1 %vm115_vm0, %v18_v13 }
  0x13   :  { %171 = vmatpush1.bf16.msra.mxu1 %v502_v12  ;;  %194 = vmatprep.mubr.bf16.mxu1 %v568_v2 }
  0x14   :  { %172 = vmatprep.subr.bf16.mxu1 %v507_v14 }
  0x15   :  { %8 = vsyncpa [#allocation3], 0  ;;  %v508_v17 = vld [vmem:[%s702_s1 + $0x28] ss:$16 sps:$4 sm:$0xff]   ;;  %v513_v18 = vld [vmem:[%s702_s1 + $0xc] ss:$16 sps:$4 sm:$0xff]  }
  0x16   :  { %v511_v19 = vld [vmem:[%s702_s1 + $0x8] ss:$16 sps:$4 sm:$0xff]   ;;  %v516_v22 = vld [vmem:[%s703_s2 + $0x70] sm:$0xff]   ;;  %v520_v26 = vld [vmem:[%s703_s2 + $0x60] sm:$0xff]  }
  0x17   :  { %173 = vmatpush1.bf16.msra.mxu1 %v505_v15  ;;  %v514_v20 = vld [vmem:[%s703_s2 + $0x78] sm:$0xff]   ;;  %v517_v23 = vld [vmem:[%s703_s2 + $0x30] sm:$0xff]   ;;  %v518_v24 = vld [vmem:[%s703_s2 + $0x68] sm:$0xff]  }
  0x18   :  { %174 = vmatprep.subr.bf16.mxu1 %v510_v16  ;;  %v515_v21 = vld [vmem:[%s703_s2 + $0x38] sm:$0xff]   ;;  %464 = vmatprep.subr.bf16.mxu0 %v514_v20  ;;  %v519_v25 = vld [vmem:[%s703_s2 + $0x28] sm:$0xff]   ;;  %v521_v27 = vld [vmem:[%s703_s2 + $0x20] sm:$0xff]  }
  0x19   :  { %465 = vmatpush3.bf16.msra.mxu0 %v515_v21  ;;  %v522_v28 = vld [vmem:[%s703_s2 + $0x58] sm:$0xff]   ;;  %v524_v30 = vld [vmem:[%s703_s2 + $0x50] sm:$0xff]   ;;  %v526_v32 = vld [vmem:[%s703_s2 + $0x48] sm:$0xff]  }
  0x1a   :  { %466 = vmatprep.subr.bf16.mxu0 %v516_v22  ;;  %v523_v29 = vld [vmem:[%s703_s2 + $0x18] sm:$0xff]   ;;  %v525_v31 = vld [vmem:[%s703_s2 + $0x10] sm:$0xff]   ;;  %v527_v33 = vld [vmem:[%s703_s2 + $0x8] sm:$0xff]  }
  0x1b   :  { %175 = vmatpush1.bf16.msra.mxu1 %v508_v17  ;;  %v528_v34 = vld [vmem:[%s703_s2 + $0x40] sm:$0xff]  }
  0x1c   :  { %176 = vmatprep.subr.bf16.mxu1 %v513_v18  ;;  %v529_v35 = vld [vmem:[%s703_s2] sm:$0xff]   ;;  %s569_s2 = smov [#allocation2]  }
  0x1d   :  { %467 = vmatpush3.bf16.msra.mxu0 %v517_v23  ;;  %s415_s23 = sshll.u32 %s569_s2, 4  ;;  %s416_s23 = int_to_ptr.vmem [resolvable:$true] %s415_s23 }
  0x1e   :  { %468 = vmatprep.subr.bf16.mxu0 %v518_v24  ;;  %s546_s24 = scalar_lea.vmem %s416_s23, 256  ;;  %p551_p1 = scmp.lt.s32.totalorder %s416_s23, %s416_s23 }
  0x1f   :  { %177 = vmatpush1.bf16.msra.mxu1 %v511_v19  ;;  %p547_p0 = scmp.ne.s32.totalorder %s416_s23, %s546_s24  ;;  %p552_p2 = scmp.lt.s32.totalorder %s546_s24, %s546_s24 }
  0x21   :  { %469 = vmatpush3.bf16.msra.mxu0 %v519_v25  ;;  %p553_p3 = por %p552_p2, %p551_p1 }
  0x22   :  { %443 = vmatmul.mubr.msk.bf16.vlgmr.msra.gmra.mxu1 %vm115_vm0, %v18_v13  ;;  %470 = vmatprep.subr.bf16.mxu0 %v520_v26 }
  0x23   :  { %p554_p4 = pnand %p553_p3, %p547_p0 }
  0x25   :  { %471 = vmatpush3.bf16.msra.mxu0 %v521_v27 }
  0x26   :  { %472 = vmatprep.subr.bf16.mxu0 %v522_v28 }
  0x29   :  { %473 = vmatpush3.bf16.msra.mxu0 %v523_v29 }
  0x2a   :  { %474 = vmatprep.subr.bf16.mxu0 %v524_v30 }
  0x2d   :  { %475 = vmatpush3.bf16.msra.mxu0 %v525_v31 }
  0x2e   :  { %476 = vmatprep.subr.bf16.mxu0 %v526_v32 }
  0x31   :  { %477 = vmatpush3.bf16.msra.mxu0 %v527_v33 }
  0x32   :  { %478 = vmatprep.subr.bf16.mxu0 %v528_v34 }
  0x35   :  { %479 = vmatpush3.bf16.msra.mxu0 %v529_v35 }
  0xd2   :  { %v153_v36 = vpop.f32.mrf.mxu1 }
  0xd3   :  { %v444_v37 = vmul.f32 -1.442695, %v153_v36 }
  0xd4   :  { %v155_v38 = vpop.f32.mrf.mxu1 }
  0xd5   :  { %530 = vpow2.f32 %v444_v37  ;;  %v445_v39 = vmul.f32 -1.442695, %v155_v38 }
  0xd6   :  { %v157_v40 = vpop.f32.mrf.mxu1 }
  0xd7   :  { %532 = vpow2.f32 %v445_v39  ;;  %v446_v41 = vmul.f32 -1.442695, %v157_v40 }
  0xd8   :  { %v159_v42 = vpop.f32.mrf.mxu1 }
  0xd9   :  { %534 = vpow2.f32 %v446_v41  ;;  %v447_v43 = vmul.f32 -1.442695, %v159_v42 }
  0xdb   :  { %536 = vpow2.f32 %v447_v43 }
  0xe2   :  { %v531_v44 = vpop.eup %530  ;;  %v196_v52 = vpop.f32.mrf.mxu1 }
  0xe3   :  { %v217_v46 = vadd.f32 1.0, %v531_v44 }
  0xe4   :  { %v533_v45 = vpop.eup %532  ;;  %v198_v53 = vpop.f32.mrf.mxu1 }
  0xe5   :  { %v218_v47 = vadd.f32 1.0, %v533_v45 }
  0xe6   :  { %v535_v48 = vpop.eup %534  ;;  %v200_v57 = vpop.f32.mrf.mxu1 }
  0xe7   :  { %538 = vrcp.f32 %v218_v47  ;;  %v219_v49 = vadd.f32 1.0, %v535_v48 }
  0xe8   :  { %v537_v50 = vpop.eup %536  ;;  %540 = vrcp.f32 %v217_v46  ;;  %v202_v0 = vpop.f32.mrf.mxu1 }
  0xe9   :  { %542 = vrcp.f32 %v219_v49  ;;  %v220_v51 = vadd.f32 1.0, %v537_v50 }
  0xeb   :  { %544 = vrcp.f32 %v220_v51 }
  0xf4   :  { %v539_v54 = vpop.eup %538 }
  0xf5   :  { %v541_v55 = vpop.eup %540  ;;  %v230_v58 = vmul.f32 %v539_v54, %v155_v38 }
  0xf6   :  { %v543_v56 = vpop.eup %542  ;;  %v229_v61 = vmul.f32 %v541_v55, %v153_v36 }
  0xf7   :  { %v231_v59 = vmul.f32 %v543_v56, %v157_v40  ;;  %v234_v1 = vmul.f32 %v230_v58, %v198_v53 }
  0xf8   :  { %v545_v60 = vpop.eup %544  ;;  %v233_v3 = vmul.f32 %v229_v61, %v196_v52 }
  0xf9   :  { %v232_v62 = vmul.f32 %v545_v60, %v159_v42  ;;  %v235_v63 = vmul.f32 %v231_v59, %v200_v57 }
  0xfb   :  { %v236_v2 = vmul.f32 %v232_v62, %v202_v0  ;;  %v237_v5 = vpack.c.bf16 %v235_v63, %v233_v3 }
  0xfd   :  { %v238_v4 = vpack.c.bf16 %v236_v2, %v234_v1 }
  0xff   :  { %399 = vmatprep.mubr.bf16.mxu0 %v238_v4 }
 0x100   :  { %400 = vmatmul.mubr.bf16.vlgmr.msra.gmra.mxu0 %v237_v5 }
 0x1c0   :  { %v480_v6 = vpop.f32.mrf.mxu0 }
 0x1c2   :  { %v481_v7 = vpop.f32.mrf.mxu0 }
 0x1c3   :  { %v482_v8 = vadd.f32 %v481_v7, %v480_v6 }
 0x1c4   :  { %v483_v9 = vpop.f32.mrf.mxu0 }
 0x1c5   :  { %408 = vst.msk [vmem:[#allocation2] sm:$0xff] %vm115_vm0, %v482_v8 }
 0x1c6   :  { %v484_v10 = vpop.f32.mrf.mxu0 }
 0x1c7   :  { %v485_v11 = vadd.f32 %v484_v10, %v483_v9 }
 0x1c9   :  { %409 = vst.msk [vmem:[#allocation2 + $0x8] sm:$0xff] %vm115_vm0, %v485_v11 }
 0x1ca   :  { %557 = shalt.err (!%p554_p4)
}
 0x1cb   :  { %s570_s25 = smov 128   ;;  %s571_s26 = smov 8  }
 0x1cc   :  { %421 = dma.vmem_to_hbm [thread:$0]  %s416_s23, 256, %s704_s3, [#allocation3], %s570_s25, %s570_s25, %s571_s26  }
 0x1cd   :  { %566 = dma.done.wait [#allocation3], 256  }
 0x1ce   :  { %567 = vsyncadd [#allocation3], 4294967040 }
 0x1cf   :  { %425 = vsyncpa [#allocation3], 1 }

</bundles_post_ra>
